<compile_context>
chip_gen: v5e
topology: v5e:2x2
jax: 0.10.0
libtpu: 0.0.40
codegen_flags: <defaults>
</compile_context>

<pallas_src>
import jax
import jax.numpy as jnp
from jax import lax
from jax.experimental import pallas as pl
from jax.experimental.pallas import tpu as pltpu

_EPS = 1e-5
_LANE = 128
_SUBLANE = 8

# Resident-bytes budget below which the fully fused (gridless) kernel is used.
# Chosen conservatively for v7x (64 MiB physical VMEM per TensorCore); v5e/v6e
# have 128 MiB so this is comfortably safe on every generation.
_FUSED_RESIDENT_BUDGET = 24 << 20
_FUSED_VMEM_LIMIT = 48 << 20        # explicit scoped-VMEM limit, fused path
_TILED_VMEM_LIMIT = 32 << 20        # explicit scoped-VMEM limit, tiled path


def _round_up(n, m):
    return ((n + m - 1) // m) * m


def _pad2d(x, rows, cols):
    return jnp.pad(x, ((0, rows - x.shape[0]), (0, cols - x.shape[1])))


# --------------------------------------------------------------------------
# Path 1: fully fused, gridless, everything VMEM-resident (small batch).
# --------------------------------------------------------------------------
def _make_fused_mlp_kernel(num_layers, n_real, n_rows):
    """Fused forward; n_real = real batch rows, n_rows = padded batch rows."""
    inv_n = 1.0 / float(n_real)
    need_row_mask = n_rows != n_real

    def kernel(*refs):
        # refs = (x, [w,b,gamma,beta] * (L-1), w_last, b_last, o)
        x_ref = refs[0]
        o_ref = refs[-1]

        if need_row_mask:
            row = lax.broadcasted_iota(jnp.int32, (n_rows, 1), 0)
            valid = (row < n_real).astype(jnp.float32)

        act = x_ref[...]                                   # bf16 (n_rows, Kp0)
        idx = 1
        for i in range(num_layers):
            last = i == num_layers - 1
            w = refs[idx][...]                             # bf16 (Kp, Mp)
            b = refs[idx + 1][...]                         # f32  (1, Mp)
            idx += 2

            # bf16 MXU matmul, f32 accumulation.
            y = jnp.dot(act.astype(jnp.bfloat16), w,
                        preferred_element_type=jnp.float32) + b
            if last:
                act = y
                break

            gamma = refs[idx][...]                         # f32 (1, Mp)
            beta = refs[idx + 1][...]                      # f32 (1, Mp)
            idx += 2

            z = jnp.maximum(y, 0.0)                        # ReLU
            # Two-pass batch statistics (biased variance), matching
            # BatchNorm1d training semantics.  Padded rows masked out.
            zm = z * valid if need_row_mask else z
            mean = jnp.sum(zm, axis=0, keepdims=True) * inv_n
            d = z - mean
            if need_row_mask:
                d = d * valid
            var = jnp.sum(d * d, axis=0, keepdims=True) * inv_n
            inv_std = lax.rsqrt(var + _EPS)
            # Folded BN affine: single FMA over the (n_rows, Mp) tile.
            # Padded feature lanes have gamma == 0, so scale == 0 and those
            # lanes stay exactly 0 even though inv_std = 1/sqrt(eps) there.
            scale = gamma * inv_std
            shift = beta - mean * scale
            act = z * scale + shift

        o_ref[...] = act.astype(o_ref.dtype)

    return kernel


def _fused_vmem_estimate(n, pads_in, pads_out):
    """Rough resident-bytes estimate for the fused path."""
    n_pad = _round_up(n, _SUBLANE)
    max_w = max(pads_in + pads_out)
    est = n_pad * pads_in[0] * 2                 # bf16 input
    est += n_pad * pads_out[-1] * 4              # f32 output
    est += 3 * n_pad * max_w * 4                 # live f32 activation temps
    for kp, mp in zip(pads_in, pads_out):
        est += kp * mp * 2 + 3 * mp * 4          # weights + bias/gamma/beta
    return est


def _dnn_forward_fused(x, params, pads_in, pads_out, vmem_limit):
    n = x.shape[0]
    L = len(params)
    n_pad = _round_up(n, _SUBLANE)
    dims_in = [w.shape[0] for (w, _, _, _) in params]
    dims_out = [w.shape[1] for (w, _, _, _) in params]

    # bf16 input halves the dominant HBM->VMEM DMA.
    flat_inputs = [_pad2d(x.astype(jnp.float32), n_pad,
                          pads_in[0]).astype(jnp.bfloat16)]
    for i, (w, b, gamma, beta) in enumerate(params):
        kp, mp = pads_in[i], pads_out[i]
        flat_inputs.append(_pad2d(w, kp, mp).astype(jnp.bfloat16))   # bf16 W
        flat_inputs.append(_pad2d(b.reshape(1, -1), 1, mp))          # f32 bias
        if i < L - 1:
            flat_inputs.append(_pad2d(gamma.reshape(1, -1), 1, mp))  # f32 gamma
            flat_inputs.append(_pad2d(beta.reshape(1, -1), 1, mp))   # f32 beta

    out_pad = pads_out[-1]
    flops = sum(2 * n * dims_in[i] * dims_out[i] for i in range(L))
    transcendentals = sum(pads_out[:-1])          # one rsqrt lane per BN feat
    bytes_accessed = sum(int(a.size) * a.dtype.itemsize for a in flat_inputs)
    bytes_accessed += n_pad * out_pad * 4
    cost = pl.CostEstimate(flops=flops, transcendentals=transcendentals,
                           bytes_accessed=bytes_accessed)

    vmem_spec = pl.BlockSpec(memory_space=pltpu.MemorySpace.VMEM)
    out_padded = pl.pallas_call(
        _make_fused_mlp_kernel(L, n, n_pad),
        out_shape=jax.ShapeDtypeStruct((n_pad, out_pad), jnp.float32),
        in_specs=[vmem_spec] * len(flat_inputs),
        out_specs=vmem_spec,
        cost_estimate=cost,
        compiler_params=pltpu.CompilerParams(vmem_limit_bytes=vmem_limit),
    )(*flat_inputs)

    return out_padded[:n, :dims_out[-1]]


# --------------------------------------------------------------------------
# Path 2: batch-tiled per-layer kernels (parallel batch grid; large batch).
# --------------------------------------------------------------------------
def _make_hidden_layer_kernel(n_real, tile_m):
    """BN(prev)-affine -> Linear -> ReLU -> per-tile BN partial stats."""
    def kernel(zp_ref, scale_ref, shift_ref, w_ref, b_ref,
               z_ref, s1_ref, s2_ref):
        t = pl.program_id(0)
        # Previous layer's folded BN affine fused as a pre-matmul FMA
        # (identity affine for the first layer).
        a = zp_ref[...].astype(jnp.float32) * scale_ref[...] + shift_ref[...]
        y = jnp.dot(a.astype(jnp.bfloat16), w_ref[...],
                    preferred_element_type=jnp.float32) + b_ref[...]
        z = jnp.maximum(y, 0.0)
        # Partial BN statistics for this batch tile; padded rows masked out.
        row = t * tile_m + lax.broadcasted_iota(jnp.int32, (tile_m, 1), 0)
        valid = (row < n_real).astype(jnp.float32)
        zm = z * valid
        s1_ref[...] = jnp.sum(zm, axis=0, keepdims=True).reshape(1, 1, -1)
        s2_ref[...] = jnp.sum(zm * zm, axis=0, keepdims=True).reshape(1, 1, -1)
        z_ref[...] = z

    return kernel


def _last_layer_kernel(zp_ref, scale_ref, shift_ref, w_ref, b_ref, y_ref):
    a = zp_ref[...].astype(jnp.float32) * scale_ref[...] + shift_ref[...]
    y_ref[...] = jnp.dot(a.astype(jnp.bfloat16), w_ref[...],
                         preferred_element_type=jnp.float32) + b_ref[...]


def _dnn_forward_tiled(x, params, pads_in, pads_out, tile_m, vmem_limit):
    n = x.shape[0]
    L = len(params)
    tile_m = max(tile_m, _SUBLANE)
    n_pad = _round_up(n, tile_m)
    nt = n_pad // tile_m

    cp = pltpu.CompilerParams(dimension_semantics=("parallel",),
                              vmem_limit_bytes=vmem_limit)

    # bf16 input halves the dominant HBM->VMEM DMA.
    act = _pad2d(x.astype(jnp.float32), n_pad, pads_in[0]).astype(jnp.bfloat16)
    scale = jnp.ones((1, pads_in[0]), jnp.float32)    # identity affine, layer 0
    shift = jnp.zeros((1, pads_in[0]), jnp.float32)

    for i, (w, b, gamma, beta) in enumerate(params):
        kp, mp = pads_in[i], pads_out[i]
        wp = _pad2d(w, kp, mp).astype(jnp.bfloat16)
        bp = _pad2d(b.reshape(1, -1), 1, mp)
        last = i == L - 1

        # Activation tiles stream over the batch grid; weights / bias / BN
        # affine use batch-constant index maps so they are DMA'd once and
        # stay VMEM-resident across all batch tiles.
        act_spec = pl.BlockSpec((tile_m, kp), lambda t: (t, 0))
        vec_spec = pl.BlockSpec((1, kp), lambda t: (0, 0))
        w_spec = pl.BlockSpec((kp, mp), lambda t: (0, 0))
        bias_spec = pl.BlockSpec((1, mp), lambda t: (0, 0))
        out_act_spec = pl.BlockSpec((tile_m, mp), lambda t: (t, 0))

        if last:
            y = pl.pallas_call(
                _last_layer_kernel,
                grid=(nt,),
                in_specs=[act_spec, vec_spec, vec_spec, w_spec, bias_spec],
                out_specs=out_act_spec,
                out_shape=jax.ShapeDtypeStruct((n_pad, mp), jnp.float32),
                compiler_params=cp,
            )(act, scale, shift, wp, bp)
            return y[:n, :w.shape[1]]

        stat_spec = pl.BlockSpec((1, 1, mp), lambda t: (t, 0, 0))
        z, s1p, s2p = pl.pallas_call(
            _make_hidden_layer_kernel(n, tile_m),
            grid=(nt,),
            in_specs=[act_spec, vec_spec, vec_spec, w_spec, bias_spec],
            out_specs=[out_act_spec, stat_spec, stat_spec],
            out_shape=[jax.ShapeDtypeStruct((n_pad, mp), jnp.float32),
                       jax.ShapeDtypeStruct((nt, 1, mp), jnp.float32),
                       jax.ShapeDtypeStruct((nt, 1, mp), jnp.float32)],
            compiler_params=cp,
        )(act, scale, shift, wp, bp)

        # Tiny cross-tile reduction + folded BN affine ((1, mp) work only).
        inv_n = 1.0 / float(n)
        mean = jnp.sum(s1p, axis=0) * inv_n                      # (1, mp)
        var = jnp.maximum(jnp.sum(s2p, axis=0) * inv_n - mean * mean, 0.0)
        inv_std = lax.rsqrt(var + _EPS)
        gp = _pad2d(gamma.reshape(1, -1), 1, mp)
        bt = _pad2d(beta.reshape(1, -1), 1, mp)
        scale = gp * inv_std          # padded lanes: gamma == 0 -> scale == 0
        shift = bt - mean * scale
        act = z                       # normalization applied in next kernel

    raise AssertionError("unreachable")


# --------------------------------------------------------------------------
# Public entry point.
# --------------------------------------------------------------------------
def dnn_forward(x, params, *, batch_tile=128, force_tiled=False):
    """Pallas implementation of DNN.forward."""
    L = len(params)
    dims_in = [w.shape[0] for (w, _, _, _) in params]
    dims_out = [w.shape[1] for (w, _, _, _) in params]
    for i in range(L - 1):
        assert dims_out[i] == dims_in[i + 1], "layer widths must chain"
    pads_in = [_round_up(d, _LANE) for d in dims_in]
    pads_out = [_round_up(d, _LANE) for d in dims_out]

    resident = _fused_vmem_estimate(x.shape[0], pads_in, pads_out)
    if force_tiled or resident > _FUSED_RESIDENT_BUDGET:
        return _dnn_forward_tiled(x, params, pads_in, pads_out,
                                  batch_tile, _TILED_VMEM_LIMIT)
    return _dnn_forward_fused(x, params, pads_in, pads_out, _FUSED_VMEM_LIMIT)


def init_dnn_params(key, layers):
    """Deterministic init matching the PyTorch module's parameter shapes.

    Linear: W ~ U(-1/sqrt(in), 1/sqrt(in)) stored as (in, out); b likewise.
    BatchNorm1d: gamma = 1, beta = 0.
    """
    params = []
    for in_size, out_size in zip(layers, layers[1:]):
        key, kw, kb = jax.random.split(key, 3)
        bound = 1.0 / jnp.sqrt(jnp.float32(in_size))
        w = jax.random.uniform(kw, (in_size, out_size), jnp.float32, -bound, bound)
        b = jax.random.uniform(kb, (1, out_size), jnp.float32, -bound, bound)
        gamma = jnp.ones((1, out_size), jnp.float32)
        beta = jnp.zeros((1, out_size), jnp.float32)
        params.append((w, b, gamma, beta))
    return params


def dnn_forward_ref(x, params):
    """Pure-JAX reference (same bf16 matmul / f32 epilogue numerics)."""
    L = len(params)
    act = x
    for i, (w, b, gamma, beta) in enumerate(params):
        y = jnp.dot(act.astype(jnp.bfloat16), w.astype(jnp.bfloat16),
                    preferred_element_type=jnp.float32) + b
        if i < L - 1:
            y = jnp.maximum(y, 0.0)
            mean = jnp.mean(y, axis=0, keepdims=True)
            var = jnp.mean((y - mean) ** 2, axis=0, keepdims=True)
            y = (y - mean) / jnp.sqrt(var + _EPS) * gamma + beta
        act = y
    return act


if __name__ == "__main__":
    layers = [32, 64, 48, 16]   # small synthetic layer sizes

    key = jax.random.PRNGKey(0)
    key, kx1, kx2 = jax.random.split(key, 3)
    params = init_dnn_params(key, layers)

    # Small batch: fully fused, gridless, everything VMEM-resident.
    x_small = jax.random.normal(kx1, (8, layers[0]), jnp.float32)
    out_small = jax.block_until_ready(dnn_forward(x_small, params))
    ref_small = dnn_forward_ref(x_small, params)
    assert out_small.shape == (8, layers[-1])
    assert jnp.allclose(out_small, ref_small, atol=1e-2, rtol=1e-2), \
        "fused path mismatch vs reference"

    # Non-multiple larger batch: batch-tiled parallel grid path with
    # cross-tile BN statistics and VMEM-resident parameters.
    x_big = jax.random.normal(kx2, (200, layers[0]), jnp.float32)
    out_big = jax.block_until_ready(
        dnn_forward(x_big, params, batch_tile=128, force_tiled=True))
    ref_big = dnn_forward_ref(x_big, params)
    assert out_big.shape == (200, layers[-1])
    assert jnp.allclose(out_big, ref_big, atol=1e-2, rtol=1e-2), \
        "tiled path mismatch vs reference"

    print("KERNEL_OK")
</pallas_src>

<mosaic_0001>
module attributes {stable_mosaic.version = 11 : i64} {
  func.func @kernel(%arg0: memref<8x128xbf16, #tpu.memory_space<vmem>>, %arg1: memref<128x128xbf16, #tpu.memory_space<vmem>>, %arg2: memref<1x128xf32, #tpu.memory_space<vmem>>, %arg3: memref<1x128xf32, #tpu.memory_space<vmem>>, %arg4: memref<1x128xf32, #tpu.memory_space<vmem>>, %arg5: memref<128x128xbf16, #tpu.memory_space<vmem>>, %arg6: memref<1x128xf32, #tpu.memory_space<vmem>>, %arg7: memref<1x128xf32, #tpu.memory_space<vmem>>, %arg8: memref<1x128xf32, #tpu.memory_space<vmem>>, %arg9: memref<128x128xbf16, #tpu.memory_space<vmem>>, %arg10: memref<1x128xf32, #tpu.memory_space<vmem>>, %arg11: memref<8x128xf32, #tpu.memory_space<vmem>>) attributes {dimension_semantics = [], scalar_prefetch = 0 : i64, scratch_operands = 0 : i64, tpu.core_type = #tpu.core_type<tc>} {
    %c0 = arith.constant 0 : index
    %c0_0 = arith.constant 0 : index
    %0 = vector.load %arg0[%c0, %c0_0] : memref<8x128xbf16, #tpu.memory_space<vmem>>, vector<8x128xbf16>
    %c0_1 = arith.constant 0 : index
    %c0_2 = arith.constant 0 : index
    %1 = vector.load %arg1[%c0_1, %c0_2] : memref<128x128xbf16, #tpu.memory_space<vmem>>, vector<128x128xbf16>
    %c0_3 = arith.constant 0 : index
    %c0_4 = arith.constant 0 : index
    %2 = vector.load %arg2[%c0_3, %c0_4] : memref<1x128xf32, #tpu.memory_space<vmem>>, vector<1x128xf32>
    %cst = arith.constant dense<0.000000e+00> : vector<8x128xf32>
    %3 = tpu.matmul %0, %1, %cst {dimension_numbers = #tpu.dot_dimension_numbers<[1], [0], [0], [1], [0, 0, 1, 1], [], []>} : vector<8x128xbf16>, vector<128x128xbf16>, vector<8x128xf32> -> vector<8x128xf32>
    %4 = vector.broadcast %2 : vector<1x128xf32> to vector<8x128xf32>
    %5 = arith.addf %3, %4 : vector<8x128xf32>
    %c0_5 = arith.constant 0 : index
    %c0_6 = arith.constant 0 : index
    %6 = vector.load %arg3[%c0_5, %c0_6] : memref<1x128xf32, #tpu.memory_space<vmem>>, vector<1x128xf32>
    %c0_7 = arith.constant 0 : index
    %c0_8 = arith.constant 0 : index
    %7 = vector.load %arg4[%c0_7, %c0_8] : memref<1x128xf32, #tpu.memory_space<vmem>>, vector<1x128xf32>
    %cst_9 = arith.constant 0.000000e+00 : f32
    %8 = vector.broadcast %cst_9 : f32 to vector<8x128xf32>
    %9 = arith.maximumf %5, %8 : vector<8x128xf32>
    %cst_10 = arith.constant dense<0.000000e+00> : vector<128xf32>
    %10 = vector.multi_reduction <add>, %9, %cst_10 [0] : vector<8x128xf32> to vector<128xf32>
    %11 = vector.shape_cast %10 : vector<128xf32> to vector<1x128xf32>
    %cst_11 = arith.constant 1.250000e-01 : f32
    %12 = vector.broadcast %cst_11 : f32 to vector<1x128xf32>
    %13 = arith.mulf %11, %12 : vector<1x128xf32>
    %14 = vector.broadcast %13 : vector<1x128xf32> to vector<8x128xf32>
    %15 = arith.subf %9, %14 : vector<8x128xf32>
    %16 = arith.mulf %15, %15 : vector<8x128xf32>
    %cst_12 = arith.constant dense<0.000000e+00> : vector<128xf32>
    %17 = vector.multi_reduction <add>, %16, %cst_12 [0] : vector<8x128xf32> to vector<128xf32>
    %18 = vector.shape_cast %17 : vector<128xf32> to vector<1x128xf32>
    %cst_13 = arith.constant 1.250000e-01 : f32
    %19 = vector.broadcast %cst_13 : f32 to vector<1x128xf32>
    %20 = arith.mulf %18, %19 : vector<1x128xf32>
    %cst_14 = arith.constant 9.99999974E-6 : f32
    %21 = vector.broadcast %cst_14 : f32 to vector<1x128xf32>
    %22 = arith.addf %20, %21 : vector<1x128xf32>
    %23 = math.rsqrt %22 : vector<1x128xf32>
    %24 = arith.mulf %6, %23 : vector<1x128xf32>
    %25 = arith.mulf %13, %24 : vector<1x128xf32>
    %26 = arith.subf %7, %25 : vector<1x128xf32>
    %27 = vector.broadcast %24 : vector<1x128xf32> to vector<8x128xf32>
    %28 = arith.mulf %9, %27 : vector<8x128xf32>
    %29 = vector.broadcast %26 : vector<1x128xf32> to vector<8x128xf32>
    %30 = arith.addf %28, %29 : vector<8x128xf32>
    %c0_15 = arith.constant 0 : index
    %c0_16 = arith.constant 0 : index
    %31 = vector.load %arg5[%c0_15, %c0_16] : memref<128x128xbf16, #tpu.memory_space<vmem>>, vector<128x128xbf16>
    %c0_17 = arith.constant 0 : index
    %c0_18 = arith.constant 0 : index
    %32 = vector.load %arg6[%c0_17, %c0_18] : memref<1x128xf32, #tpu.memory_space<vmem>>, vector<1x128xf32>
    %33 = arith.truncf %30 : vector<8x128xf32> to vector<8x128xbf16>
    %cst_19 = arith.constant dense<0.000000e+00> : vector<8x128xf32>
    %34 = tpu.matmul %33, %31, %cst_19 {dimension_numbers = #tpu.dot_dimension_numbers<[1], [0], [0], [1], [0, 0, 1, 1], [], []>} : vector<8x128xbf16>, vector<128x128xbf16>, vector<8x128xf32> -> vector<8x128xf32>
    %35 = vector.broadcast %32 : vector<1x128xf32> to vector<8x128xf32>
    %36 = arith.addf %34, %35 : vector<8x128xf32>
    %c0_20 = arith.constant 0 : index
    %c0_21 = arith.constant 0 : index
    %37 = vector.load %arg7[%c0_20, %c0_21] : memref<1x128xf32, #tpu.memory_space<vmem>>, vector<1x128xf32>
    %c0_22 = arith.constant 0 : index
    %c0_23 = arith.constant 0 : index
    %38 = vector.load %arg8[%c0_22, %c0_23] : memref<1x128xf32, #tpu.memory_space<vmem>>, vector<1x128xf32>
    %cst_24 = arith.constant 0.000000e+00 : f32
    %39 = vector.broadcast %cst_24 : f32 to vector<8x128xf32>
    %40 = arith.maximumf %36, %39 : vector<8x128xf32>
    %cst_25 = arith.constant dense<0.000000e+00> : vector<128xf32>
    %41 = vector.multi_reduction <add>, %40, %cst_25 [0] : vector<8x128xf32> to vector<128xf32>
    %42 = vector.shape_cast %41 : vector<128xf32> to vector<1x128xf32>
    %cst_26 = arith.constant 1.250000e-01 : f32
    %43 = vector.broadcast %cst_26 : f32 to vector<1x128xf32>
    %44 = arith.mulf %42, %43 : vector<1x128xf32>
    %45 = vector.broadcast %44 : vector<1x128xf32> to vector<8x128xf32>
    %46 = arith.subf %40, %45 : vector<8x128xf32>
    %47 = arith.mulf %46, %46 : vector<8x128xf32>
    %cst_27 = arith.constant dense<0.000000e+00> : vector<128xf32>
    %48 = vector.multi_reduction <add>, %47, %cst_27 [0] : vector<8x128xf32> to vector<128xf32>
    %49 = vector.shape_cast %48 : vector<128xf32> to vector<1x128xf32>
    %cst_28 = arith.constant 1.250000e-01 : f32
    %50 = vector.broadcast %cst_28 : f32 to vector<1x128xf32>
    %51 = arith.mulf %49, %50 : vector<1x128xf32>
    %cst_29 = arith.constant 9.99999974E-6 : f32
    %52 = vector.broadcast %cst_29 : f32 to vector<1x128xf32>
    %53 = arith.addf %51, %52 : vector<1x128xf32>
    %54 = math.rsqrt %53 : vector<1x128xf32>
    %55 = arith.mulf %37, %54 : vector<1x128xf32>
    %56 = arith.mulf %44, %55 : vector<1x128xf32>
    %57 = arith.subf %38, %56 : vector<1x128xf32>
    %58 = vector.broadcast %55 : vector<1x128xf32> to vector<8x128xf32>
    %59 = arith.mulf %40, %58 : vector<8x128xf32>
    %60 = vector.broadcast %57 : vector<1x128xf32> to vector<8x128xf32>
    %61 = arith.addf %59, %60 : vector<8x128xf32>
    %c0_30 = arith.constant 0 : index
    %c0_31 = arith.constant 0 : index
    %62 = vector.load %arg9[%c0_30, %c0_31] : memref<128x128xbf16, #tpu.memory_space<vmem>>, vector<128x128xbf16>
    %c0_32 = arith.constant 0 : index
    %c0_33 = arith.constant 0 : index
    %63 = vector.load %arg10[%c0_32, %c0_33] : memref<1x128xf32, #tpu.memory_space<vmem>>, vector<1x128xf32>
    %64 = arith.truncf %61 : vector<8x128xf32> to vector<8x128xbf16>
    %cst_34 = arith.constant dense<0.000000e+00> : vector<8x128xf32>
    %65 = tpu.matmul %64, %62, %cst_34 {dimension_numbers = #tpu.dot_dimension_numbers<[1], [0], [0], [1], [0, 0, 1, 1], [], []>} : vector<8x128xbf16>, vector<128x128xbf16>, vector<8x128xf32> -> vector<8x128xf32>
    %66 = vector.broadcast %63 : vector<1x128xf32> to vector<8x128xf32>
    %67 = arith.addf %65, %66 : vector<8x128xf32>
    %c0_35 = arith.constant 0 : index
    %c0_36 = arith.constant 0 : index
    %68 = vector.load %arg11[%c0_35, %c0_36] : memref<8x128xf32, #tpu.memory_space<vmem>>, vector<8x128xf32>
    tpu.vector_store %arg11[%c0_35, %c0_36], %67 {strides = array<i32>} : memref<8x128xf32, #tpu.memory_space<vmem>>, vector<8x128xf32>,
    return
  }
}

</mosaic_0001>

<bundles_post_ra>
// kernel: tpu_custom_call.1
= control target key start
LH: loop header
LB: loop body
LE: loop exit
PB: predicated region body
PF: predicated region fallthrough
CT: control target
= control target key end

     0   :  { %16 = vsyncpa [#allocation3], 0  ;;  %s813_s0 = inlined_call_operand.hbm [shape: bf16[8,128], index: 0, kind: input, shape index: {}]   ;;  %s814_s1 = inlined_call_operand.hbm [shape: bf16[128,128], index: 1, kind: input, shape index: {}]   ;;  %s815_s2 = inlined_call_operand.vmem [shape: f32[1,128], index: 2, kind: input, shape index: {}]   ;;  %s816_s3 = inlined_call_operand.vmem [shape: f32[1,128], index: 3, kind: input, shape index: {}]   ;;  %s817_s4 = inlined_call_operand.vmem [shape: f32[1,128], index: 4, kind: input, shape index: {}]   ;;  %s818_s5 = inlined_call_operand.hbm [shape: bf16[128,128], index: 5, kind: input, shape index: {}]   ;;  %s819_s6 = inlined_call_operand.vmem [shape: f32[1,128], index: 6, kind: input, shape index: {}]   ;;  %s820_s7 = inlined_call_operand.vmem [shape: f32[1,128], index: 7, kind: input, shape index: {}]   ;;  %s821_s8 = inlined_call_operand.vmem [shape: f32[1,128], index: 8, kind: input, shape index: {}]   ;;  %s822_s9 = inlined_call_operand.hbm [shape: bf16[128,128], index: 9, kind: input, shape index: {}]   ;;  %s823_s10 = inlined_call_operand.vmem [shape: f32[1,128], index: 10, kind: input, shape index: {}]   ;;  %s824_s11 = inlined_call_operand.hbm [shape: f32[8,128], index: 11, kind: output, shape index: {}]  }
   0x1   :  { %17 = vsyncpa [#allocation6], 0 }
   0x2   :  { %18 = vsyncpa [#allocation9], 0  ;;  %s35_s19 = sshll.u32 %s814_s1, 4  ;;  %s36_s19 = int_to_ptr.hbm [resolvable:$true] %s35_s19 }
   0x3   :  { %19 = vsyncpa [#allocation4], 0  ;;  %s710_s20 = smov [#allocation5]   ;;  %s25_s24 = sshll.u32 %s813_s0, 4  ;;  %s26_s24 = int_to_ptr.hbm [resolvable:$true] %s25_s24 }
   0x4   :  { %s37_s21 = sshll.u32 %s710_s20, 4  ;;  %s711_s25 = smov 64   ;;  %s38_s21 = int_to_ptr.vmem [resolvable:$true] %s37_s21 }
   0x5   :  { %s712_s26 = smov 4   ;;  %s713_s27 = smov [#allocation2]  }
   0x6   :  { %43 = dma.hbm_to_vmem [thread:$0]  %s36_s19, 1024, %s38_s21, [#allocation6], %s711_s25, %s711_s25, %s712_s26  }
   0x7   :  { %s27_s28 = sshll.u32 %s713_s27, 4  ;;  %s54_s12 = sshll.u32 %s818_s5, 4  ;;  %s28_s28 = int_to_ptr.vmem [resolvable:$true] %s27_s28  ;;  %s55_s12 = int_to_ptr.hbm [resolvable:$true] %s54_s12 }
   0x8   :  { %30 = dma.hbm_to_vmem [thread:$0]  %s26_s24, 64, %s28_s28, [#allocation3]  }
   0x9   :  { %s73_s14 = sshll.u32 %s822_s9, 4  ;;  %s714_s15 = smov [#allocation7]   ;;  %s74_s14 = int_to_ptr.hbm [resolvable:$true] %s73_s14 }
   0xa   :  { %s56_s16 = sshll.u32 %s714_s15, 4  ;;  %s715_s0 = smov [#allocation8]   ;;  %s57_s16 = int_to_ptr.vmem [resolvable:$true] %s56_s16 }
   0xb   :  { %62 = dma.hbm_to_vmem [thread:$0]  %s55_s12, 1024, %s57_s16, [#allocation6], %s711_s25, %s711_s25, %s712_s26  }
   0xc   :  { %s75_s17 = sshll.u32 %s715_s0, 4  ;;  %s76_s17 = int_to_ptr.vmem [resolvable:$true] %s75_s17 }
   0xd   :  { %81 = dma.hbm_to_vmem [thread:$0]  %s74_s14, 1024, %s76_s17, [#allocation9], %s711_s25, %s711_s25, %s712_s26  }
   0xe   :  { %702 = dma.done.wait [#allocation3], 64  }
   0xf   :  { %703 = vsyncadd [#allocation3], 4294967232 }
  0x10   :  { %704 = dma.done.wait [#allocation6], 2048  }
  0x11   :  { %705 = vsyncadd [#allocation6], 4294965248 }
  0x12   :  { %706 = dma.done.wait [#allocation9], 1024  }
  0x13   :  { %707 = vsyncadd [#allocation9], 4294966272  ;;  %v551_v0 = vld [vmem:[#allocation5 + $0x38] sm:$0xff]  ;;  %v550_v1 = vld [vmem:[#allocation5 + $0x30] sm:$0xff]  ;;  %s436_s29 = sshll.u32 %s824_s11, 4  ;;  %s437_s29 = int_to_ptr.hbm [resolvable:$true] %s436_s29 }
  0x14   :  { %169 = vmatpush.bf16.msra.mxu0 %v551_v0  ;;  %v549_v2 = vld [vmem:[#allocation5 + $0x28] sm:$0xff]  ;;  %v548_v3 = vld [vmem:[#allocation5 + $0x20] sm:$0xff]  ;;  %v547_v4 = vld [vmem:[#allocation5 + $0x18] sm:$0xff] }
  0x15   :  { %v546_v5 = vld [vmem:[#allocation5 + $0x10] sm:$0xff]  ;;  %v545_v6 = vld [vmem:[#allocation5 + $0x8] sm:$0xff]  ;;  %v544_v7 = vld [vmem:[#allocation5] sm:$0xff] }
  0x16   :  { %v100_v8 = vld [vmem:[#allocation2] sm:$0xf]  ;;  %v558_v10 = vld [vmem:[#allocation7 + $0x30] sm:$0xff]  ;;  %v557_v11 = vld [vmem:[#allocation7 + $0x28] sm:$0xff] }
  0x17   :  { %v559_v9 = vld [vmem:[#allocation7 + $0x38] sm:$0xff]  ;;  %v556_v12 = vld [vmem:[#allocation7 + $0x20] sm:$0xff]  ;;  %v554_v14 = vld [vmem:[#allocation7 + $0x10] sm:$0xff] }
  0x18   :  { %170 = vmatpush.bf16.msra.mxu0 %v550_v1  ;;  %292 = vmatpush.bf16.msra.mxu1 %v559_v9  ;;  %v555_v13 = vld [vmem:[#allocation7 + $0x18] sm:$0xff]  ;;  %v553_v16 = vld [vmem:[#allocation7 + $0x8] sm:$0xff]  ;;  %v552_v20 = vld [vmem:[#allocation7] sm:$0xff] }
  0x19   :  { %v575_v15 = vld [vmem:[%s815_s2] ss:$0 sm:$0xff]  ;;  %v566_v57 = vld [vmem:[#allocation8 + $0x30] sm:$0xff]  ;;  %v565_v58 = vld [vmem:[#allocation8 + $0x28] sm:$0xff] }
  0x1a   :  { %v182_v44 = vld [vmem:[%s816_s3] sm:$0x1]  ;;  %v564_v59 = vld [vmem:[#allocation8 + $0x20] sm:$0xff]  ;;  %v562_v61 = vld [vmem:[#allocation8 + $0x10] sm:$0xff] }
  0x1b   :  { %v183_v48 = vld [vmem:[%s817_s4] sm:$0x1]  ;;  %v561_v63 = vld [vmem:[#allocation8 + $0x8] sm:$0xff] }
  0x1c   :  { %171 = vmatpush.bf16.msra.mxu0 %v549_v2  ;;  %293 = vmatpush.bf16.msra.mxu1 %v558_v10  ;;  %v567_v56 = vld [vmem:[#allocation8 + $0x38] sm:$0xff] }
  0x1d   :  { %415 = vmatpush.bf16.msra.mxu2 %v567_v56  ;;  %v563_v60 = vld [vmem:[#allocation8 + $0x18] sm:$0xff] }
  0x1e   :  { %v576_v62 = vld [vmem:[%s819_s6] ss:$0 sm:$0xff] }
  0x20   :  { %172 = vmatpush.bf16.msra.mxu0 %v548_v3  ;;  %294 = vmatpush.bf16.msra.mxu1 %v557_v11  ;;  %v560_v3 = vld [vmem:[#allocation8] sm:$0xff] }
  0x21   :  { %416 = vmatpush.bf16.msra.mxu2 %v566_v57 }
  0x24   :  { %173 = vmatpush.bf16.msra.mxu0 %v547_v4  ;;  %295 = vmatpush.bf16.msra.mxu1 %v556_v12 }
  0x25   :  { %417 = vmatpush.bf16.msra.mxu2 %v565_v58 }
  0x28   :  { %174 = vmatpush.bf16.msra.mxu0 %v546_v5  ;;  %296 = vmatpush.bf16.msra.mxu1 %v555_v13 }
  0x29   :  { %418 = vmatpush.bf16.msra.mxu2 %v564_v59 }
  0x2c   :  { %175 = vmatpush.bf16.msra.mxu0 %v545_v6  ;;  %297 = vmatpush.bf16.msra.mxu1 %v554_v14 }
  0x2d   :  { %419 = vmatpush.bf16.msra.mxu2 %v563_v60 }
  0x30   :  { %176 = vmatpush.bf16.msra.mxu0 %v544_v7  ;;  %298 = vmatpush.bf16.msra.mxu1 %v553_v16 }
  0x31   :  { %420 = vmatpush.bf16.msra.mxu2 %v562_v61 }
  0x33   :  { %177 = vmatmul.bf16.vlgmr.msra.gmra.mxu0 %v100_v8 }
  0x34   :  { %299 = vmatpush.bf16.msra.mxu1 %v552_v20 }
  0x35   :  { %421 = vmatpush.bf16.msra.mxu2 %v561_v63 }
  0x39   :  { %422 = vmatpush.bf16.msra.mxu2 %v560_v3 }
  0xb0   :  { %v178_v17 = vpop.f32.mrf.mxu0 }
  0xb1   :  { %v179_v18 = vadd.f32 %v575_v15, %v178_v17 }
  0xb3   :  { %v184_v19 = vmax.f32 %v179_v18, 0.0 }
  0xb5   :  { %v185_v21 = vrot.slane %v184_v19, 4 }
  0xb7   :  { %v186_v22 = vadd.f32 %v185_v21, %v184_v19 }
  0xb8   :  { %v180_v23 = vpop.f32.mrf.mxu0 }
  0xb9   :  { %v187_v24 = vrot.slane %v186_v22, 2 }
  0xbb   :  { %v188_v25 = vadd.f32 %v187_v24, %v186_v22 }
  0xbd   :  { %v189_v26 = vrot.slane %v188_v25, 1 }
  0xbf   :  { %v190_v27 = vadd.f32 %v189_v26, %v188_v25 }
  0xc1   :  { %v191_v28 = vmul.f32 0.125, %v190_v27  ;;  %v305_v27 = vld [vmem:[%s820_s7] sm:$0x1]  ;;  %s716_s7 = smov [#allocation10]  }
  0xc2   :  { %s434_s26 = sshll.u32 %s716_s7, 4  ;;  %s435_s26 = int_to_ptr.vmem [resolvable:$true] %s434_s26 }
  0xc3   :  { %v192_v29 = vsub.f32 %v184_v19, %v191_v28 }
  0xc5   :  { %v193_v30 = vmul.f32 %v192_v29, %v192_v29 }
  0xc7   :  { %v194_v31 = vrot.slane %v193_v30, 4 }
  0xc9   :  { %v195_v32 = vadd.f32 %v194_v31, %v193_v30  ;;  %v306_v31 = vld [vmem:[%s821_s8] sm:$0x1] }
  0xcb   :  { %v196_v33 = vrot.slane %v195_v32, 2 }
  0xcd   :  { %v197_v34 = vadd.f32 %v196_v33, %v195_v32 }
  0xcf   :  { %v198_v35 = vrot.slane %v197_v34, 1 }
  0xd1   :  { %v199_v36 = vadd.f32 %v198_v35, %v197_v34 }
  0xd3   :  { %v200_v37 = vmul.f32 0.125, %v199_v36 }
  0xd5   :  { %v201_v38 = vadd.f32 1e-05, %v200_v37 }
  0xd7   :  { %578 = vrsqrt.f32 %v201_v38  ;;  %vm208_vm1 = vweird.f32 %v201_v38 }
  0xdd   :  { %v579_v39 = vpop.eup %578 }
  0xde   :  { %v203_v40 = vmul.f32 %v579_v39, %v201_v38  ;;  %vm209_vm0 = vweird.f32 %v579_v39 }
  0xdf   :  { %vm210_vm2 = vmor %vm208_vm1, %vm209_vm0 }
  0xe0   :  { %v204_v41 = vmul.f32 %v579_v39, %v203_v40 }
  0xe2   :  { %v205_v42 = vmul.f32 0.5, %v204_v41 }
  0xe4   :  { %v206_v43 = vsub.f32 1.5, %v205_v42 }
  0xe6   :  { %v207_v45 = vmul.f32 %v579_v39, %v206_v43 }
  0xe8   :  { %v211_v46 = vsel %vm210_vm2, %v579_v39, %v207_v45  ;;  %v577_v39 = vld [vmem:[%s823_s10] ss:$0 sm:$0xff] }
  0xe9   :  { %v212_v47 = vmul.f32 %v211_v46, %v182_v44 }
  0xeb   :  { %v213_v49 = vmul.f32 %v212_v47, %v191_v28  ;;  %v216_v50 = vperm.slane %v212_v47, 0 }
  0xed   :  { %v214_v51 = vsub.f32 %v183_v48, %v213_v49  ;;  %v218_v52 = vmul.f32 %v216_v50, %v184_v19 }
  0xef   :  { %v220_v53 = vperm.slane %v214_v51, 0 }
  0xf1   :  { %v222_v54 = vadd.f32 %v220_v53, %v218_v52 }
  0xf3   :  { %v240_v55 = vpack.c.bf16 %v222_v54, %v222_v54 }
  0xf5   :  { %300 = vmatmul.bf16.vlgmr.msra.gmra.mxu1 %v240_v55 }
 0x172   :  { %v301_v0 = vpop.f32.mrf.mxu1 }
 0x173   :  { %v302_v1 = vadd.f32 %v576_v62, %v301_v0 }
 0x175   :  { %v307_v2 = vmax.f32 %v302_v1, 0.0 }
 0x177   :  { %v308_v4 = vrot.slane %v307_v2, 4 }
 0x179   :  { %v309_v5 = vadd.f32 %v308_v4, %v307_v2 }
 0x17a   :  { %v303_v6 = vpop.f32.mrf.mxu1 }
 0x17b   :  { %v310_v7 = vrot.slane %v309_v5, 2 }
 0x17d   :  { %v311_v8 = vadd.f32 %v310_v7, %v309_v5 }
 0x17f   :  { %v312_v9 = vrot.slane %v311_v8, 1 }
 0x181   :  { %v313_v10 = vadd.f32 %v312_v9, %v311_v8 }
 0x183   :  { %v314_v11 = vmul.f32 0.125, %v313_v10 }
 0x185   :  { %v315_v12 = vsub.f32 %v307_v2, %v314_v11 }
 0x187   :  { %v316_v13 = vmul.f32 %v315_v12, %v315_v12 }
 0x189   :  { %v317_v14 = vrot.slane %v316_v13, 4 }
 0x18b   :  { %v318_v15 = vadd.f32 %v317_v14, %v316_v13 }
 0x18d   :  { %v319_v16 = vrot.slane %v318_v15, 2 }
 0x18f   :  { %v320_v17 = vadd.f32 %v319_v16, %v318_v15 }
 0x191   :  { %v321_v18 = vrot.slane %v320_v17, 1 }
 0x193   :  { %v322_v19 = vadd.f32 %v321_v18, %v320_v17 }
 0x195   :  { %v323_v20 = vmul.f32 0.125, %v322_v19 }
 0x197   :  { %v324_v21 = vadd.f32 1e-05, %v323_v20 }
 0x199   :  { %580 = vrsqrt.f32 %v324_v21  ;;  %vm331_vm4 = vweird.f32 %v324_v21 }
 0x19f   :  { %v581_v22 = vpop.eup %580 }
 0x1a0   :  { %v326_v23 = vmul.f32 %v581_v22, %v324_v21  ;;  %vm332_vm3 = vweird.f32 %v581_v22 }
 0x1a1   :  { %vm333_vm5 = vmor %vm331_vm4, %vm332_vm3 }
 0x1a2   :  { %v327_v24 = vmul.f32 %v581_v22, %v326_v23 }
 0x1a4   :  { %v328_v25 = vmul.f32 0.5, %v327_v24 }
 0x1a6   :  { %v329_v26 = vsub.f32 1.5, %v328_v25 }
 0x1a8   :  { %v330_v28 = vmul.f32 %v581_v22, %v329_v26 }
 0x1aa   :  { %v334_v29 = vsel %vm333_vm5, %v581_v22, %v330_v28 }
 0x1ab   :  { %v335_v30 = vmul.f32 %v334_v29, %v305_v27 }
 0x1ad   :  { %v336_v32 = vmul.f32 %v335_v30, %v314_v11  ;;  %v339_v33 = vperm.slane %v335_v30, 0 }
 0x1af   :  { %v337_v34 = vsub.f32 %v306_v31, %v336_v32  ;;  %v341_v35 = vmul.f32 %v339_v33, %v307_v2 }
 0x1b1   :  { %v343_v36 = vperm.slane %v337_v34, 0 }
 0x1b3   :  { %v345_v37 = vadd.f32 %v343_v36, %v341_v35 }
 0x1b5   :  { %v363_v38 = vpack.c.bf16 %v345_v37, %v345_v37 }
 0x1b7   :  { %423 = vmatmul.bf16.vlgmr.msra.gmra.mxu2 %v363_v38 }
 0x23a   :  { %v424_v40 = vpop.f32.mrf.mxu2 }
 0x23b   :  { %v425_v41 = vadd.f32 %v577_v39, %v424_v40 }
 0x23d   :  { %428 = vst [vmem:[#allocation10] sm:$0xff] %v425_v41 }
 0x23e   :  { %439 = dma.vmem_to_hbm [thread:$0]  %s435_s26, 128, %s437_s29, [#allocation4]  }
 0x242   :  { %v426_v42 = vpop.f32.mrf.mxu2 }
 0x243   :  { %708 = dma.done.wait [#allocation4], 128  }
 0x244   :  { %709 = vsyncadd [#allocation4], 4294967168 }
 0x245   :  { %444 = vsyncpa [#allocation3], 1 }
 0x246   :  { %445 = vsyncpa [#allocation6], 1 }
 0x247   :  { %446 = vsyncpa [#allocation9], 1 }
 0x248   :  { %447 = vsyncpa [#allocation4], 1 }

</bundles_post_ra>
